<compile_context>
chip_gen: v5e
topology: v5e:2x2
jax: 0.10.0
libtpu: 0.0.40
codegen_flags: <defaults>
</compile_context>

<pallas_src>
import jax
import jax.numpy as jnp
from jax import lax
from jax.experimental import pallas as pl
from jax.experimental.pallas import tpu as pltpu

LANES = 128
SUBLANES = 8
HIDDEN = 4


def _mlp_kernel(params_ref, x_ref, o_ref):
    """Fused Linear(1->4) -> ReLU -> Linear(4->1) on a lane-dense batch slab.

    params_ref: SMEM f32[13] (scalar-prefetched)
                [a0..a3, c0..c3, w2_0..w2_3, b2] with a_j = w2_j*w1_j and
                c_j = w2_j*b1_j (second-layer weight folded into layer 1).
    x_ref, o_ref: VMEM (tile_rows, 128) f32 slabs of the flattened batch.
    """
    x = x_ref[...]
    # Start the accumulator from the output bias (single broadcast, no add).
    acc = jnp.full_like(x, params_ref[3 * HIDDEN])
    # Fully unrolled over the 4 hidden units: pure VPU elementwise work,
    # 4 ops/element/unit (mul, add, max-or-min, add). MXU never touched.
    for j in range(HIDDEN):
        t = x * params_ref[j] + params_ref[HIDDEN + j]          # a_j*x + c_j
        # w2_j * relu(w1_j*x + b1_j) == max(t,0) if w2_j>=0 else min(t,0).
        h = lax.cond(params_ref[2 * HIDDEN + j] >= 0.0,
                     lambda v: jnp.maximum(v, 0.0),
                     lambda v: jnp.minimum(v, 0.0),
                     t)
        acc = acc + h
    o_ref[...] = acc.astype(o_ref.dtype)


def _round_up(v, m):
    return ((v + m - 1) // m) * m


def _pallas_forward(x, params, *, max_tile_rows):
    B = x.shape[0]

    # Pad only to one whole (8,128) vreg slab (1024 elements), NOT to the tile
    # grid; Pallas edge-masks the ragged last block itself.
    B_pad = _round_up(B, SUBLANES * LANES)
    x_flat = x.reshape(B)
    if B_pad != B:
        x_flat = jnp.pad(x_flat, (0, B_pad - B))
    rows = B_pad // LANES
    x2d = x_flat.reshape(rows, LANES)

    # Tile sizing: biggest tile up to max_tile_rows (1 MiB at 2048 rows), but
    # clamp so the grid keeps >= 2 steps whenever possible so v7x's two
    # TensorCores (each with its own HBM path) both get work.
    tile_rows = min(max_tile_rows,
                    max(SUBLANES, _round_up(pl.cdiv(rows, 2), SUBLANES)))
    grid = (pl.cdiv(rows, tile_rows),)

    out2d = pl.pallas_call(
        _mlp_kernel,
        out_shape=jax.ShapeDtypeStruct((rows, LANES), jnp.float32),
        grid_spec=pltpu.PrefetchScalarGridSpec(
            # 13 folded scalars DMA'd to SMEM once before the grid runs.
            num_scalar_prefetch=1,
            grid=grid,
            in_specs=[
                # Batch slab: tiled + auto double-buffered HBM<->VMEM.
                pl.BlockSpec((tile_rows, LANES), lambda i, params: (i, 0)),
            ],
            out_specs=pl.BlockSpec((tile_rows, LANES), lambda i, params: (i, 0)),
        ),
        compiler_params=pltpu.CompilerParams(
            dimension_semantics=("parallel",)),
    )(params, x2d)

    # Padded lanes hold garbage-but-finite values; keep this slice (or a mask)
    # if anything downstream ever reduces over the slab.
    return out2d.reshape(B_pad, 1)[:B]


def linear_regression_model(x, w1, b1, w2, b2, *, max_tile_rows=2048,
                            min_pallas_batch=8192):
    """Forward pass of LinearRegressionModel.

    Args:
      x:  (B, 1) float32
      w1: (1, 4) float32  -- transposed PyTorch weight of linear_1
      b1: (4,)   float32
      w2: (4, 1) float32  -- transposed PyTorch weight of linear_2
      b2: (1,)   float32
    Returns:
      (B, 1) float32
    """
    B = x.shape[0]
    if B < min_pallas_batch:
        # Tiny batches: pallas_call launch + padding overhead dwarfs the work
        # on every generation; the fused XLA expression is strictly faster.
        return jnp.maximum(x @ w1 + b1, 0.0) @ w2 + b2

    w1f = w1.reshape(HIDDEN).astype(jnp.float32)
    b1f = b1.reshape(HIDDEN).astype(jnp.float32)
    w2f = w2.reshape(HIDDEN).astype(jnp.float32)
    # Fold layer 2 into layer 1: y = b2 + sum_j clamp_j(a_j*x + c_j).
    params = jnp.concatenate(
        [w2f * w1f, w2f * b1f, w2f, b2.reshape(1).astype(jnp.float32)])
    return _pallas_forward(x.astype(jnp.float32), params,
                           max_tile_rows=max_tile_rows)


def init_params(key):
    """PyTorch-style init; weights returned pre-transposed to (in, out)."""
    k1, k2, k3, k4 = jax.random.split(key, 4)
    bound1 = 1.0 / jnp.sqrt(1.0)  # linear_1: in_features = 1
    bound2 = 1.0 / jnp.sqrt(4.0)  # linear_2: in_features = 4
    w1 = jax.random.uniform(k1, (1, 4), jnp.float32, -bound1, bound1)
    b1 = jax.random.uniform(k2, (4,), jnp.float32, -bound1, bound1)
    w2 = jax.random.uniform(k3, (4, 1), jnp.float32, -bound2, bound2)
    b2 = jax.random.uniform(k4, (1,), jnp.float32, -bound2, bound2)
    return w1, b1, w2, b2


def _reference(x, w1, b1, w2, b2):
    return jnp.maximum(x @ w1 + b1, 0.0) @ w2 + b2


if __name__ == "__main__":
    key = jax.random.PRNGKey(0)
    k_x1, k_x2, k_p = jax.random.split(key, 3)
    w1, b1, w2, b2 = init_params(k_p)

    # Small batch matching the original module usage; force the Pallas path
    # (min_pallas_batch=0) so the kernel itself is exercised. grid = (1,).
    B = 8
    x = jax.random.normal(k_x1, (B, 1), dtype=jnp.float32)
    out = linear_regression_model(x, w1, b1, w2, b2, min_pallas_batch=0)
    jax.block_until_ready(out)
    ref = _reference(x, w1, b1, w2, b2)
    assert out.shape == (B, 1)
    assert jnp.allclose(out, ref, atol=1e-5, rtol=1e-5)

    # Non-aligned batch: pads to 3072 elems -> 24 rows, tile_rows = 16 ->
    # 2 "parallel" grid steps (one per v7x core) with a ragged last block
    # that Pallas edge-masks.
    B2 = 2500
    x2 = jax.random.normal(k_x2, (B2, 1), dtype=jnp.float32)
    out2 = linear_regression_model(x2, w1, b1, w2, b2, min_pallas_batch=0)
    jax.block_until_ready(out2)
    ref2 = _reference(x2, w1, b1, w2, b2)
    assert out2.shape == (B2, 1)
    assert jnp.allclose(out2, ref2, atol=1e-5, rtol=1e-5)

    # Default behavior: tiny batches short-circuit to the fused XLA path.
    out3 = linear_regression_model(x, w1, b1, w2, b2)
    jax.block_until_ready(out3)
    assert jnp.allclose(out3, ref, atol=1e-5, rtol=1e-5)

    print("KERNEL_OK")
</pallas_src>

<mosaic_0001>
module attributes {stable_mosaic.version = 11 : i64} {
  func.func @_mlp_kernel(%arg0: i32, %arg1: memref<13xf32, #tpu.memory_space<smem>>, %arg2: memref<8x128xf32, #tpu.memory_space<vmem>>, %arg3: memref<8x128xf32, #tpu.memory_space<vmem>>) attributes {dimension_semantics = [#tpu.dimension_semantics<parallel>], iteration_bounds = array<i64: 1>, scalar_prefetch = 1 : i64, scratch_operands = 0 : i64, tpu.core_type = #tpu.core_type<tc>, window_params = [{transform_indices = @transform_0, window_bounds = array<i64: 8, 128>}, {transform_indices = @transform_1, window_bounds = array<i64: 8, 128>}]} {
    %c0 = arith.constant 0 : index
    %c0_0 = arith.constant 0 : index
    %0 = vector.load %arg2[%c0, %c0_0] : memref<8x128xf32, #tpu.memory_space<vmem>>, vector<8x128xf32>
    %c12 = arith.constant 12 : index
    %1 = memref.load %arg1[%c12] : memref<13xf32, #tpu.memory_space<smem>>
    %2 = vector.broadcast %1 : f32 to vector<8x128xf32>
    %c0_1 = arith.constant 0 : index
    %3 = memref.load %arg1[%c0_1] : memref<13xf32, #tpu.memory_space<smem>>
    %4 = vector.broadcast %3 : f32 to vector<8x128xf32>
    %5 = arith.mulf %0, %4 : vector<8x128xf32>
    %c4 = arith.constant 4 : index
    %6 = memref.load %arg1[%c4] : memref<13xf32, #tpu.memory_space<smem>>
    %7 = vector.broadcast %6 : f32 to vector<8x128xf32>
    %8 = arith.addf %5, %7 : vector<8x128xf32>
    %c8 = arith.constant 8 : index
    %9 = memref.load %arg1[%c8] : memref<13xf32, #tpu.memory_space<smem>>
    %cst = arith.constant 0.000000e+00 : f32
    %10 = arith.cmpf oge, %9, %cst : f32
    %11 = arith.extui %10 : i1 to i32
    %c0_i32 = arith.constant 0 : i32
    %12 = arith.cmpi ne, %11, %c0_i32 : i32
    %13 = scf.if %12 -> (vector<8x128xf32>) {
      %cst_10 = arith.constant 0.000000e+00 : f32
      %52 = vector.broadcast %cst_10 : f32 to vector<8x128xf32>
      %53 = arith.maximumf %8, %52 : vector<8x128xf32>
      scf.yield %53 : vector<8x128xf32>
    } else {
      %cst_10 = arith.constant 0.000000e+00 : f32
      %52 = vector.broadcast %cst_10 : f32 to vector<8x128xf32>
      %53 = arith.minimumf %8, %52 : vector<8x128xf32>
      scf.yield %53 : vector<8x128xf32>
    }
    %14 = arith.addf %2, %13 : vector<8x128xf32>
    %c1 = arith.constant 1 : index
    %15 = memref.load %arg1[%c1] : memref<13xf32, #tpu.memory_space<smem>>
    %16 = vector.broadcast %15 : f32 to vector<8x128xf32>
    %17 = arith.mulf %0, %16 : vector<8x128xf32>
    %c5 = arith.constant 5 : index
    %18 = memref.load %arg1[%c5] : memref<13xf32, #tpu.memory_space<smem>>
    %19 = vector.broadcast %18 : f32 to vector<8x128xf32>
    %20 = arith.addf %17, %19 : vector<8x128xf32>
    %c9 = arith.constant 9 : index
    %21 = memref.load %arg1[%c9] : memref<13xf32, #tpu.memory_space<smem>>
    %cst_2 = arith.constant 0.000000e+00 : f32
    %22 = arith.cmpf oge, %21, %cst_2 : f32
    %23 = arith.extui %22 : i1 to i32
    %c0_i32_3 = arith.constant 0 : i32
    %24 = arith.cmpi ne, %23, %c0_i32_3 : i32
    %25 = scf.if %24 -> (vector<8x128xf32>) {
      %cst_10 = arith.constant 0.000000e+00 : f32
      %52 = vector.broadcast %cst_10 : f32 to vector<8x128xf32>
      %53 = arith.maximumf %20, %52 : vector<8x128xf32>
      scf.yield %53 : vector<8x128xf32>
    } else {
      %cst_10 = arith.constant 0.000000e+00 : f32
      %52 = vector.broadcast %cst_10 : f32 to vector<8x128xf32>
      %53 = arith.minimumf %20, %52 : vector<8x128xf32>
      scf.yield %53 : vector<8x128xf32>
    }
    %26 = arith.addf %14, %25 : vector<8x128xf32>
    %c2 = arith.constant 2 : index
    %27 = memref.load %arg1[%c2] : memref<13xf32, #tpu.memory_space<smem>>
    %28 = vector.broadcast %27 : f32 to vector<8x128xf32>
    %29 = arith.mulf %0, %28 : vector<8x128xf32>
    %c6 = arith.constant 6 : index
    %30 = memref.load %arg1[%c6] : memref<13xf32, #tpu.memory_space<smem>>
    %31 = vector.broadcast %30 : f32 to vector<8x128xf32>
    %32 = arith.addf %29, %31 : vector<8x128xf32>
    %c10 = arith.constant 10 : index
    %33 = memref.load %arg1[%c10] : memref<13xf32, #tpu.memory_space<smem>>
    %cst_4 = arith.constant 0.000000e+00 : f32
    %34 = arith.cmpf oge, %33, %cst_4 : f32
    %35 = arith.extui %34 : i1 to i32
    %c0_i32_5 = arith.constant 0 : i32
    %36 = arith.cmpi ne, %35, %c0_i32_5 : i32
    %37 = scf.if %36 -> (vector<8x128xf32>) {
      %cst_10 = arith.constant 0.000000e+00 : f32
      %52 = vector.broadcast %cst_10 : f32 to vector<8x128xf32>
      %53 = arith.maximumf %32, %52 : vector<8x128xf32>
      scf.yield %53 : vector<8x128xf32>
    } else {
      %cst_10 = arith.constant 0.000000e+00 : f32
      %52 = vector.broadcast %cst_10 : f32 to vector<8x128xf32>
      %53 = arith.minimumf %32, %52 : vector<8x128xf32>
      scf.yield %53 : vector<8x128xf32>
    }
    %38 = arith.addf %26, %37 : vector<8x128xf32>
    %c3 = arith.constant 3 : index
    %39 = memref.load %arg1[%c3] : memref<13xf32, #tpu.memory_space<smem>>
    %40 = vector.broadcast %39 : f32 to vector<8x128xf32>
    %41 = arith.mulf %0, %40 : vector<8x128xf32>
    %c7 = arith.constant 7 : index
    %42 = memref.load %arg1[%c7] : memref<13xf32, #tpu.memory_space<smem>>
    %43 = vector.broadcast %42 : f32 to vector<8x128xf32>
    %44 = arith.addf %41, %43 : vector<8x128xf32>
    %c11 = arith.constant 11 : index
    %45 = memref.load %arg1[%c11] : memref<13xf32, #tpu.memory_space<smem>>
    %cst_6 = arith.constant 0.000000e+00 : f32
    %46 = arith.cmpf oge, %45, %cst_6 : f32
    %47 = arith.extui %46 : i1 to i32
    %c0_i32_7 = arith.constant 0 : i32
    %48 = arith.cmpi ne, %47, %c0_i32_7 : i32
    %49 = scf.if %48 -> (vector<8x128xf32>) {
      %cst_10 = arith.constant 0.000000e+00 : f32
      %52 = vector.broadcast %cst_10 : f32 to vector<8x128xf32>
      %53 = arith.maximumf %44, %52 : vector<8x128xf32>
      scf.yield %53 : vector<8x128xf32>
    } else {
      %cst_10 = arith.constant 0.000000e+00 : f32
      %52 = vector.broadcast %cst_10 : f32 to vector<8x128xf32>
      %53 = arith.minimumf %44, %52 : vector<8x128xf32>
      scf.yield %53 : vector<8x128xf32>
    }
    %50 = arith.addf %38, %49 : vector<8x128xf32>
    %c0_8 = arith.constant 0 : index
    %c0_9 = arith.constant 0 : index
    %51 = vector.load %arg3[%c0_8, %c0_9] : memref<8x128xf32, #tpu.memory_space<vmem>>, vector<8x128xf32>
    tpu.vector_store %arg3[%c0_8, %c0_9], %50 {strides = array<i32>} : memref<8x128xf32, #tpu.memory_space<vmem>>, vector<8x128xf32>,
    return
  }
  func.func @transform_0(%arg0: i32, %arg1: memref<13xf32, #tpu.memory_space<smem>>) -> (i32, i32) {
    %c0_i32 = arith.constant 0 : i32
    %c0_i32_0 = arith.constant 0 : i32
    return %arg0, %c0_i32 : i32, i32
  }
  func.func @transform_1(%arg0: i32, %arg1: memref<13xf32, #tpu.memory_space<smem>>) -> (i32, i32) {
    %c0_i32 = arith.constant 0 : i32
    %c0_i32_0 = arith.constant 0 : i32
    return %arg0, %c0_i32 : i32, i32
  }
}

</mosaic_0001>

<bundles_post_ra>
// kernel: tpu_custom_call.1
= control target key start
LH: loop header
LB: loop body
LE: loop exit
PB: predicated region body
PF: predicated region fallthrough
CT: control target
= control target key end

     0   :  { %s250_s12 = smov [#allocation3]   ;;  %s292_s0 = inlined_call_operand.hbm [shape: f32[13], index: 0, kind: input, shape index: {}]   ;;  %s293_s1 = inlined_call_operand.hbm [shape: f32[8,128], index: 1, kind: input, shape index: {}]   ;;  %s294_s2 = inlined_call_operand.hbm [shape: f32[8,128], index: 2, kind: output, shape index: {}]  }
   0x1   :  { %s8_s11 = sshll.u32 %s292_s0, 4  ;;  %s9_s11 = int_to_ptr.hbm [resolvable:$true] %s8_s11 }
   0x2   :  { %11 = dma.hbm_to_smem %s9_s11, 16, %s250_s12, [#allocation2] }
   0x3   :  { %244 = dma.done.wait [#allocation2], 16 }
   0x4   :  { %245 = vsyncadd [#allocation2], 4294967280 }
   0x5   :  { %14 = sfence }
   0x6   :  { %15 = vsyncpa [#allocation5], 0 }
   0x7   :  { %16 = vsyncpa [#allocation6], 0  ;;  %s22_s15 = sshll.u32 %s293_s1, 4  ;;  %s251_s16 = smov [#allocation4]   ;;  %s23_s15 = int_to_ptr.hbm [resolvable:$true] %s22_s15 }
   0x8   :  { %s24_s17 = sshll.u32 %s251_s16, 4  ;;  %s25_s17 = int_to_ptr.vmem [resolvable:$true] %s24_s17 }
   0x9   :  { %27 = dma.hbm_to_vmem [thread:$0]  %s23_s15, 128, %s25_s17, [#allocation5]  }
   0xa   :  { %246 = dma.done.wait [#allocation5], 128  }
   0xb   :  { %247 = vsyncadd [#allocation5], 4294967168  ;;  %s274_s0 = sld [smem:[#allocation3 + $0xc]]  ;;  %v32_v0 = vld [vmem:[#allocation4] sm:$0xff]  ;;  %s252_s9 = smov [#allocation7]  }
   0xc   :  { %s35_s18 = sld [smem:[#allocation3]]  ;;  %s117_s10 = sshll.u32 %s252_s9, 4  ;;  %s118_s10 = int_to_ptr.vmem [resolvable:$true] %s117_s10 }
   0xd   :  { %s130_s19 = sld [smem:[#allocation3 + $0x4]]  ;;  %s119_s13 = sshll.u32 %s294_s2, 4  ;;  %s120_s13 = int_to_ptr.hbm [resolvable:$true] %s119_s13 }
   0xe   :  { %s131_s20 = sld [smem:[#allocation3 + $0x8]] }
   0xf   :  { %s132_s21 = sld [smem:[#allocation3 + $0x1]] }
  0x10   :  { %s133_s22 = sld [smem:[#allocation3 + $0x5]] }
  0x11   :  { %s134_s23 = sld [smem:[#allocation3 + $0x9]]  ;;  %v34_v23 = vstv %s274_s0 }
  0x12   :  { %v36_v1 = vstv %s35_s18  ;;  %s135_s24 = sld [smem:[#allocation3 + $0x2]] }
  0x13   :  { %v37_v2 = vmul.f32 %v36_v1, %v32_v0  ;;  %v39_v3 = vstv %s130_s19  ;;  %s136_s1 = sld [smem:[#allocation3 + $0x6]] }
  0x14   :  { %p42_p0 = scmp.ge.f32.partialorder %s131_s20, 0.0  ;;  %s276_s25 = sld [smem:[#allocation3 + $0xa]] }
  0x15   :  { %v40_v4 = vadd.f32 %v39_v3, %v37_v2  ;;  %v55_v5 = vstv %s132_s21  ;;  %s278_s26 = sld [smem:[#allocation3 + $0x3]] }
  0x16   :  { %s141_s27 = scalar_select %p42_p0, 1, 0  ;;  %v56_v6 = vmul.f32 %v55_v5, %v32_v0  ;;  %v58_v7 = vstv %s133_s22 }
  0x17   :  { %p61_p1 = scmp.ge.f32.partialorder %s134_s23, 0.0  ;;  %v46_v8 = vmax.f32 %v40_v4, 0.0  ;;  %v51_v15 = vmin.f32 %v40_v4, 0.0  ;;  %s139_s4 = sld [smem:[#allocation3 + $0x7]] }
  0x18   :  { %v142_v9 = vstv %s141_s27  ;;  %s177_s28 = scalar_select %p42_p0, 0, 1  ;;  %v59_v10 = vadd.f32 %v58_v7, %v56_v6  ;;  %v74_v11 = vstv %s135_s24 }
  0x19   :  { %vm143_vm0 = vcmp.ne.s32.totalorder %v142_v9, 0  ;;  %s150_s29 = scalar_select %p61_p1, 1, 0  ;;  %v75_v12 = vmul.f32 %v74_v11, %v32_v0  ;;  %v77_v13 = vstv %s136_s1 }
  0x1a   :  { %v147_v14 = vstv %s177_s28  ;;  %p80_p2 = scmp.ge.f32.partialorder %s276_s25, 0.0  ;;  %v144_v17 = vsel %vm143_vm0, %v46_v8, 0  ;;  %v65_v18 = vmax.f32 %v59_v10, 0.0  ;;  %v70_v25 = vmin.f32 %v59_v10, 0.0  ;;  %s140_s6 = sld [smem:[#allocation3 + $0xb]] }
  0x1b   :  { %v151_v16 = vstv %s150_s29  ;;  %s178_s30 = scalar_select %p61_p1, 0, 1  ;;  %vm148_vm1 = vcmp.ne.s32.totalorder %v147_v14, 0  ;;  %v78_v19 = vadd.f32 %v77_v13, %v75_v12  ;;  %v93_v21 = vstv %s278_s26 }
  0x1c   :  { %s159_s3 = scalar_select %p80_p2, 1, 0  ;;  %vm152_vm2 = vcmp.ne.s32.totalorder %v151_v16, 0  ;;  %v149_v24 = vsel %vm148_vm1, %v51_v15, %v144_v17  ;;  %v94_v28 = vmul.f32 %v93_v21, %v32_v0 }
  0x1d   :  { %v156_v20 = vstv %s178_s30  ;;  %s179_s5 = scalar_select %p80_p2, 0, 1  ;;  %v153_v26 = vsel %vm152_vm2, %v65_v18, 0  ;;  %v84_v27 = vmax.f32 %v78_v19, 0.0  ;;  %v53_v30 = vadd.f32 %v149_v24, %v34_v23 }
  0x1e   :  { %v160_v22 = vstv %s159_s3  ;;  %vm157_vm3 = vcmp.ne.s32.totalorder %v156_v20, 0  ;;  %v89_v32 = vmin.f32 %v78_v19, 0.0  ;;  %v96_v33 = vstv %s139_s4 }
  0x1f   :  { %vm161_vm4 = vcmp.ne.s32.totalorder %v160_v22, 0  ;;  %v165_v29 = vstv %s179_s5  ;;  %v158_v31 = vsel %vm157_vm3, %v70_v25, %v153_v26  ;;  %v97_v35 = vadd.f32 %v96_v33, %v94_v28 }
  0x20   :  { %v162_v34 = vsel %vm161_vm4, %v84_v27, 0  ;;  %vm166_vm5 = vcmp.ne.s32.totalorder %v165_v29, 0  ;;  %p99_p3 = scmp.ge.f32.partialorder %s140_s6, 0.0  ;;  %v72_v36 = vadd.f32 %v158_v31, %v53_v30 }
  0x21   :  { %v167_v37 = vsel %vm166_vm5, %v89_v32, %v162_v34  ;;  %v103_v38 = vmax.f32 %v97_v35, 0.0  ;;  %v108_v40 = vmin.f32 %v97_v35, 0.0 }
  0x22   :  { %s168_s7 = scalar_select %p99_p3, 1, 0  ;;  %v91_v41 = vadd.f32 %v167_v37, %v72_v36 }
  0x23   :  { %s180_s8 = scalar_select %p99_p3, 0, 1 }
  0x24   :  { %v169_v39 = vstv %s168_s7 }
  0x25   :  { %vm170_vm6 = vcmp.ne.s32.totalorder %v169_v39, 0  ;;  %v174_v43 = vstv %s180_s8 }
  0x26   :  { %v171_v42 = vsel %vm170_vm6, %v103_v38, 0  ;;  %vm175_vm7 = vcmp.ne.s32.totalorder %v174_v43, 0 }
  0x27   :  { %v176_v44 = vsel %vm175_vm7, %v108_v40, %v171_v42 }
  0x28   :  { %v110_v45 = vadd.f32 %v176_v44, %v91_v41 }
  0x2a   :  { %111 = vst [vmem:[#allocation7] sm:$0xff] %v110_v45 }
  0x2b   :  { %122 = dma.vmem_to_hbm [thread:$0]  %s118_s10, 128, %s120_s13, [#allocation6]  }
  0x2c   :  { %248 = dma.done.wait [#allocation6], 128  }
  0x2d   :  { %249 = vsyncadd [#allocation6], 4294967168 }
  0x2e   :  { %127 = vsyncpa [#allocation5], 1 }
  0x2f   :  { %128 = vsyncpa [#allocation6], 1 }

</bundles_post_ra>
